<compile_context>
chip_gen: v7x
topology: tpu7x:2x2x1
jax: 0.10.0
libtpu: 0.0.40
codegen_flags: <defaults>
</compile_context>

<pallas_src>
import math

import jax
import jax.numpy as jnp
import numpy as np
from jax import lax
from jax.experimental import pallas as pl
from jax.experimental.pallas import tpu as pltpu


def _round_up(x, m):
    return ((x + m - 1) // m) * m


def pos_embed_kernel(p0_ref, p1_ref, w_ref, out_ref):
    # p0_ref, p1_ref : (tm, r*3)   r logical (b, n) rows folded per kernel row
    # w_ref          : (r*3, r*C)  block-diagonal weight, 0.1 scale folded in
    # out_ref        : (tm, r*C)   folded, PyTorch-interleaved (dim_v, 3) layout
    dpos = p1_ref[...] - p0_ref[...]
    # out[m, q*C + o*3 + j] = dpos[m, q*3 + j] * (0.1 * W[o, 0])
    out_ref[...] = jnp.dot(
        dpos,
        w_ref[...],
        preferred_element_type=jnp.float32,
        precision=lax.Precision.HIGHEST,   # fp32 contract; MXU slot is idle anyway
    ).astype(out_ref.dtype)


def pos_embed(pos_0, pos_1, weight, *,
              vmem_budget_bytes=24 * 1024 * 1024,
              target_logical_rows=4096,
              min_grid_steps=4):
    """pos_0, pos_1: (B, N, 3); weight: (dim_v, 1) -> (B, N, dim_v, 3)."""
    B, N, three = pos_0.shape
    assert three == 3
    dim_v = weight.shape[0]
    M = B * N
    C = 3 * dim_v

    # Explicit dtype decision (matches PyTorch type promotion).
    out_dtype = jnp.result_type(pos_0.dtype, pos_1.dtype, weight.dtype)
    itemsize = jnp.dtype(out_dtype).itemsize

    # ---- fold factor: smallest r with (r*C) % 128 == 0 (lane-dense output).
    r = 128 // math.gcd(C, 128)
    # Keep the block-diagonal weight tiny (only binds for odd/tiny dim_v);
    # any r >= 1 is still correct, r = 128//gcd is merely lane-optimal.
    while r > 1 and (r * 3) * (r * C) * 4 > 4 * 1024 * 1024:
        r //= 2

    M_pad = r * (-(-M // r))
    M_fold = M_pad // r

    p0 = pos_0.reshape(M, 3).astype(out_dtype)
    p1 = pos_1.reshape(M, 3).astype(out_dtype)
    if M_pad != M:
        pad = ((0, M_pad - M), (0, 0))
        p0 = jnp.pad(p0, pad)
        p1 = jnp.pad(p1, pad)
    p0f = p0.reshape(M_fold, r * 3)
    p1f = p1.reshape(M_fold, r * 3)

    # ---- host-side weight prep (tiny, weight-only work):
    #   w_block[q*3 + k, q'*C + o*3 + j] = 0.1*W[o,0] if (q == q' and k == j) else 0
    w_flat = (0.1 * weight.astype(jnp.float32)).reshape(dim_v)
    eye3 = jnp.eye(3, dtype=jnp.float32)
    w_small = (w_flat[None, :, None] * eye3[:, None, :]).reshape(3, C)        # (3, C)
    if r > 1:
        eye_r = jnp.eye(r, dtype=jnp.float32)
        w_block = (eye_r[:, None, :, None] * w_small[None, :, None, :]
                   ).reshape(r * 3, r * C)
    else:
        w_block = w_small
    w_block = w_block.astype(out_dtype)

    # ---- tile size from a VMEM budget (double-buffered in/out), then capped so
    #      the grid has >= min_grid_steps steps (v7x 2-TC sharding) when M allows.
    out_row_bytes = 2 * (r * C) * itemsize                       # r*C already lane-dense
    in_row_bytes = 2 * 2 * _round_up(r * 3, 128) * itemsize      # two inputs, lane-padded
    per_row = out_row_bytes + in_row_bytes
    tm = max(8, vmem_budget_bytes // per_row)
    tm = min(tm, max(8, _round_up(max(target_logical_rows // r, 1), 8)))
    tm = min(tm, max(8, _round_up(-(-M_fold // min_grid_steps), 8)))
    tm = _round_up(tm, 8)
    if tm >= M_fold:
        tm = M_fold                            # full-extent block
    grid = (pl.cdiv(M_fold, tm),)              # last tile masked if M_fold % tm != 0

    buf_bytes = tm * per_row + 2 * w_block.size * itemsize
    vmem_limit = int(min(max(buf_bytes + (4 << 20), 16 << 20), 48 << 20))

    cost = pl.CostEstimate(
        flops=int(2 * M * 3 * C),
        transcendentals=0,
        bytes_accessed=int(2 * M * 3 * itemsize + M * C * itemsize),
    )

    out = pl.pallas_call(
        pos_embed_kernel,
        out_shape=jax.ShapeDtypeStruct((M_fold, r * C), out_dtype),
        grid=grid,
        in_specs=[
            pl.BlockSpec((tm, r * 3), lambda i: (i, 0)),
            pl.BlockSpec((tm, r * 3), lambda i: (i, 0)),
            pl.BlockSpec((r * 3, r * C), lambda i: (0, 0)),      # resident weight
        ],
        out_specs=pl.BlockSpec((tm, r * C), lambda i: (i, 0)),
        compiler_params=pltpu.CompilerParams(
            dimension_semantics=("parallel",),                   # shard rows across TCs
            vmem_limit_bytes=vmem_limit,
        ),
        cost_estimate=cost,
    )(p0f, p1f, w_block)

    # Free row-major unfold; slice only if we padded M.
    out = out.reshape(M_pad, C)
    if M_pad != M:
        out = out[:M]
    return out.reshape(B, N, dim_v, 3)


def _reference(pos_0, pos_1, weight):
    # exact PyTorch semantics of PosEmbed.forward
    return (0.1 * (pos_1 - pos_0))[:, :, None, :] * weight[None, None, :, :]


if __name__ == "__main__":
    key = jax.random.PRNGKey(0)
    k0, k1, kw = jax.random.split(key, 3)
    dim_v = 32
    # nn.Linear(1, dim_v, bias=False)-style weight
    weight = jax.random.uniform(kw, (dim_v, 1), dtype=jnp.float32,
                                minval=-1.0, maxval=1.0)

    # Test 1: multi-step grid, fold factor divides M exactly.
    batch, nodes = 2, 64
    pos_0 = jax.random.normal(k0, (batch, nodes, 3), dtype=jnp.float32)
    pos_1 = jax.random.normal(k1, (batch, nodes, 3), dtype=jnp.float32)
    out = jax.block_until_ready(pos_embed(pos_0, pos_1, weight))
    ref = _reference(pos_0, pos_1, weight)
    assert out.shape == (batch, nodes, dim_v, 3)
    np.testing.assert_allclose(np.asarray(out), np.asarray(ref),
                               rtol=1e-5, atol=1e-6)

    # Test 2: M not divisible by the fold factor (exercises the padding path).
    batch2, nodes2 = 2, 7
    pos_0b = jax.random.normal(k0, (batch2, nodes2, 3), dtype=jnp.float32)
    pos_1b = jax.random.normal(k1, (batch2, nodes2, 3), dtype=jnp.float32)
    out_b = jax.block_until_ready(pos_embed(pos_0b, pos_1b, weight))
    ref_b = _reference(pos_0b, pos_1b, weight)
    assert out_b.shape == (batch2, nodes2, dim_v, 3)
    np.testing.assert_allclose(np.asarray(out_b), np.asarray(ref_b),
                               rtol=1e-5, atol=1e-6)

    print("KERNEL_OK")
</pallas_src>

<mosaic_0001>
module attributes {stable_mosaic.version = 11 : i64} {
  func.func @pos_embed_kernel(%arg0: i32, %arg1: memref<8x12xf32, #tpu.memory_space<vmem>>, %arg2: memref<8x12xf32, #tpu.memory_space<vmem>>, %arg3: memref<12x384xf32, #tpu.memory_space<vmem>>, %arg4: memref<8x384xf32, #tpu.memory_space<vmem>>) attributes {dimension_semantics = [#tpu.dimension_semantics<parallel>], iteration_bounds = array<i64: 4>, scalar_prefetch = 0 : i64, scratch_operands = 0 : i64, tpu.core_type = #tpu.core_type<tc>, window_params = [{transform_indices = @transform_0, window_bounds = array<i64: 8, 12>}, {transform_indices = @transform_1, window_bounds = array<i64: 8, 12>}, {pipeline_mode = #tpu.pipeline_mode<synchronous>, transform_indices = @transform_2, window_bounds = array<i64: 12, 384>}, {transform_indices = @transform_3, window_bounds = array<i64: 8, 384>}]} {
    %c0 = arith.constant 0 : index
    %c0_0 = arith.constant 0 : index
    %0 = vector.load %arg2[%c0, %c0_0] : memref<8x12xf32, #tpu.memory_space<vmem>>, vector<8x12xf32>
    %c0_1 = arith.constant 0 : index
    %c0_2 = arith.constant 0 : index
    %1 = vector.load %arg1[%c0_1, %c0_2] : memref<8x12xf32, #tpu.memory_space<vmem>>, vector<8x12xf32>
    %2 = arith.subf %0, %1 : vector<8x12xf32>
    %c0_3 = arith.constant 0 : index
    %c0_4 = arith.constant 0 : index
    %3 = vector.load %arg3[%c0_3, %c0_4] : memref<12x384xf32, #tpu.memory_space<vmem>>, vector<12x384xf32>
    %cst = arith.constant dense<0.000000e+00> : vector<8x384xf32>
    %4 = tpu.matmul %2, %3, %cst {dimension_numbers = #tpu.dot_dimension_numbers<[1], [0], [0], [1], [0, 0, 1, 1], [], []>, precision = #tpu.contract_precision<fp32>} : vector<8x12xf32>, vector<12x384xf32>, vector<8x384xf32> -> vector<8x384xf32>
    %c0_5 = arith.constant 0 : index
    %c0_6 = arith.constant 0 : index
    %5 = vector.load %arg4[%c0_5, %c0_6] : memref<8x384xf32, #tpu.memory_space<vmem>>, vector<8x384xf32>
    tpu.vector_store %arg4[%c0_5, %c0_6], %4 {strides = array<i32>} : memref<8x384xf32, #tpu.memory_space<vmem>>, vector<8x384xf32>,
    return
  }
  func.func @transform_0(%arg0: i32) -> (i32, i32) {
    %c0_i32 = arith.constant 0 : i32
    %c0_i32_0 = arith.constant 0 : i32
    return %arg0, %c0_i32 : i32, i32
  }
  func.func @transform_1(%arg0: i32) -> (i32, i32) {
    %c0_i32 = arith.constant 0 : i32
    %c0_i32_0 = arith.constant 0 : i32
    return %arg0, %c0_i32 : i32, i32
  }
  func.func @transform_2(%arg0: i32) -> (i32, i32) {
    %c0_i32 = arith.constant 0 : i32
    %c0_i32_0 = arith.constant 0 : i32
    %c0_i32_1 = arith.constant 0 : i32
    return %c0_i32, %c0_i32_0 : i32, i32
  }
  func.func @transform_3(%arg0: i32) -> (i32, i32) {
    %c0_i32 = arith.constant 0 : i32
    %c0_i32_0 = arith.constant 0 : i32
    return %arg0, %c0_i32 : i32, i32
  }
}

</mosaic_0001>

<bundles_post_ra>
// kernel: tpu_custom_call.1
= control target key start
LH: loop header
LB: loop body
LE: loop exit
PB: predicated region body
PF: predicated region fallthrough
CT: control target
= control target key end

     0   :  { %8 = vsyncpa [#allocation3], 0  ;;  %s1705_s0 = inlined_call_operand.vmem [shape: f32[32,12], index: 0, kind: input, shape index: {}]   ;;  %s1706_s1 = inlined_call_operand.vmem [shape: f32[32,12], index: 1, kind: input, shape index: {}]   ;;  %s1707_s2 = inlined_call_operand.vmem [shape: f32[12,384], index: 2, kind: input, shape index: {}]   ;;  %s1708_s3 = inlined_call_operand.hbm [shape: f32[32,384], index: 3, kind: output, shape index: {}]  }
   0x1   :  { %10 = vsyncpa [#allocation3 + $0x1], 0  ;;  %s1508_s12 = smov 0   ;;  %s1510_s13 = smov 0  }
   0x2   :  { %s1512_s14 = smov 0   ;;  %s1514_s15 = smov 0  }
   0x3 LB: > { %s1529_s16 = sadd.s32 4294967295, %s1482_s15   ;;  %s1245_s17 = sadd.s32 4294967294, %s1482_s15   ;;  %s1482_s15 = sphi %s1514_s15, %s1714_s15   ;;  %s1478_s14 = sphi %s1512_s14, %s1713_s14   ;;  %s1474_s13 = sphi %s1510_s13, %s1712_s13   ;;  %s1470_s12 = sphi %s1508_s12, %s1711_s12  }
   0x4   : > { %s1533_s18 = sadd.s32 1, %s1482_s15   ;;  %s96_s19 = sadd.s32 1, %s1478_s14 }
   0x5   : > { %s93_s20 = ssub.s32 %s1482_s15, %s1533_s18  ;;  %p106_p0 = scmp.ne.s32.totalorder %s1478_s14, %s1474_s13 }
   0x6   : > { %p94_p1 = scmp.eq.s32.totalorder %s93_s20, 0  ;;  %p107_p2 = scmp.eq.s32.totalorder %s1529_s16, 3 }
   0x7   : > { %p112_p3 = scmp.ne.s32.totalorder %s1474_s13, %s1470_s12  ;;  %p113_p4 = scmp.eq.s32.totalorder %s1245_s17, 3 }
   0x8   : > { %s1544_s21 = scalar_select %p94_p1, %s1478_s14, %s96_s19  }
   0x9   : > { %p1546_p5 = por %p107_p2, %p106_p0  ;;  %p1550_p6 = por %p113_p4, %p112_p3 }
   0xa   : > { %p1248_p7 = scmp.ge.s32.totalorder %s1482_s15, 1  ;;  %p148_p8 = scmp.lt.s32.totalorder %s1482_s15, 5 }
   0xc   : > { %p149_p9 = pnand %p1248_p7, %p148_p8 }
   0xd   : > { %v187_v0 = vld [vmem:[%s1707_s2 + $0x8] sm:$0xff] (!%p149_p9)  ;;  %v190_v1 = vld [vmem:[%s1707_s2 + $0x20] sm:$0xf] (!%p149_p9)  ;;  %vm196_vm0 = vcmask (!%p149_p9), 1043456   ;;  %v189_v5 = vld [vmem:[%s1707_s2 + $0x18] sm:$0xf] (!%p149_p9) }
   0xe   : > { %152 = sbr.rel (%p149_p9) target bundleno = 307 (0x133), region = 32  ;;  %v186_v2 = vld [vmem:[%s1707_s2] sm:$0xff] (!%p149_p9)  ;;  %v201_v3 = vsel (!%p149_p9), %vm196_vm0, %v190_v1, 0  ;;  %v206_v4 = vand.u32 (!%p149_p9), 4294901760, %v187_v0  ;;  %v1484_v7 = vmov (!%p149_p9), 0.0|0.0   ;;  %v188_v8 = vld [vmem:[%s1707_s2 + $0x10] sm:$0xff] (!%p149_p9) }
   0xf   : > { %v208_v6 = vand.u32 (!%p149_p9), 4294901760, %v186_v2  ;;  %1338 = vmatprep.subr.bf16.mxu1 (!%p149_p9), %v1484_v7  ;;  %v210_v9 = vand.u32 (!%p149_p9), 4294901760, %v201_v3  ;;  %v198_v10 = vsel (!%p149_p9), %vm196_vm0, %v189_v5, 0  ;;  %v191_v11 = vld [vmem:[%s1707_s2 + $0x28] sm:$0xf] (!%p149_p9)  ;;  %v698_v12 = vand.u32 (!%p149_p9), 4294901760, %v188_v8 }
  0x10   : > { %v1577_v13 = vsub.f32 (!%p149_p9), %v187_v0, %v206_v4  ;;  %v212_v14 = vand.u32 (!%p149_p9), 4294901760, %v198_v10  ;;  %v204_v16 = vsel (!%p149_p9), %vm196_vm0, %v191_v11, 0  ;;  %v1485_v17 = vmov (!%p149_p9), 0.0   ;;  %p175_p10 = scmp.lt.s32.totalorder (!%p149_p9), %s1529_s16, 3  ;;  %s172_s26 = sand.u32 (!%p149_p9), 1, %s1474_s13  }
  0x11   : > { %v1579_v15 = vsub.f32 (!%p149_p9), %v186_v2, %v208_v6  ;;  %274 = vmatprep.mubr.f32.mxu0 (!%p149_p9), %v1485_v17  ;;  %v1584_v18 = vpack.c.bf16 (!%p149_p9), %v210_v9, %v206_v4  ;;  %v1586_v19 = vsub.f32 (!%p149_p9), %v201_v3, %v210_v9  ;;  %v701_v20 = vand.u32 (!%p149_p9), 4294901760, %v204_v16  ;;  %s1376_s27 = smul.u32 (!%p149_p9), 24, %s172_s26  ;;  %s1487_s8 = smov (!%p149_p9), [#allocation2]  }
  0x12   : > { %v1588_v21 = vsub.f32 (!%p149_p9), %v188_v8, %v698_v12  ;;  %v1590_v22 = vpack.c.bf16 (!%p149_p9), %v212_v14, %v208_v6  ;;  %v1592_v23 = vsub.f32 (!%p149_p9), %v198_v10, %v212_v14  ;;  %v288_v24 = vand.u32 (!%p149_p9), 4294901760, %v1577_v13  ;;  %s1377_s28 = smul.u32 (!%p149_p9), 384, %s1529_s16 }
  0x13   : > { %1315 = vmatprep.subr.bf16.mxu0 (!%p149_p9), %v1584_v18  ;;  %v1597_v25 = vpack.c.bf16 (!%p149_p9), %v701_v20, %v698_v12  ;;  %v1599_v26 = vsub.f32 (!%p149_p9), %v204_v16, %v701_v20  ;;  %v300_v27 = vand.u32 (!%p149_p9), 4294901760, %v1586_v19  ;;  %vm1486_vm1 = vmmov (!%p149_p9), 0   ;;  %s174_s29 = scalar_lea.vmem (!%p149_p9), [#allocation2], %s1376_s27 }
  0x14   : > { %1276 = vmatprep.mubr.msk.f32.mxu1 (!%p149_p9), %vm1486_vm1, %v1485_v17  ;;  %1317 = vmatpush1.bf16.msra.mxu0 (!%p149_p9), %v1590_v22  ;;  %v289_v28 = vsub.f32 (!%p149_p9), %v1577_v13, %v288_v24  ;;  %v294_v29 = vand.u32 (!%p149_p9), 4294901760, %v1579_v15  ;;  %v306_v30 = vand.u32 (!%p149_p9), 4294901760, %v1592_v23  ;;  %v777_v32 = vand.u32 (!%p149_p9), 4294901760, %v1588_v21  ;;  %s1174_s30 = sshll.u32 (!%p149_p9), %s174_s29, 4  ;;  %s1663_s6 = scalar_lea.hbm (!%p149_p9), %s1708_s3, %s1377_s28  ;;  %s1665_s30 = int_to_ptr.vmem [resolvable:$true] %s1174_s30 }
  0x15   : > { %s176_s9 = scalar_select %p175_p10, %s1529_s16, 3  ;;  %1340 = vmatpush3.bf16.msra.mxu1 %v1597_v25  ;;  %v301_v31 = vsub.f32 %v1586_v19, %v300_v27  ;;  %v784_v33 = vand.u32 4294901760, %v1599_v26  ;;  %vm192_vm2 = vcmask 97280   ;;  %v1322_v56 = vpack.c.bf16 %v1586_v19, %v1577_v13 }
  0x16   : > { %v290_v34 = vand.u32 4294901760, %v289_v28  ;;  %1341 = vmatprep.subr.bf16.mxu1 %v1484_v7  ;;  %v295_v39 = vsub.f32 %v1579_v15, %v294_v29  ;;  %v307_v40 = vsub.f32 %v1592_v23, %v306_v30  ;;  %v778_v43 = vsub.f32 %v1588_v21, %v777_v32  ;;  %s1160_s16 = scalar_lea.sflag [#allocation3], %s172_s26  ;;  %s1420_s7 = scalar_lea.vmem %s1665_s30, 384 }
  0x17   : > { %s1249_s10 = sshll.u32 %s176_s9, 3  ;;  %v302_v37 = vand.u32 4294901760, %v301_v31  ;;  %v785_v44 = vsub.f32 %v1599_v26, %v784_v33  ;;  %v1324_v57 = vpack.c.bf16 %v1592_v23, %v1579_v15  ;;  %v1345_v58 = vpack.c.bf16 %v1599_v26, %v1588_v21  ;;  %p1421_p11 = scmp.ne.s32.totalorder %s1665_s30, %s1420_s7 }
  0x18   : > { %s178_s19 = scalar_lea.vmem %s1705_s0, %s1249_s10  ;;  %s182_s25 = scalar_lea.vmem %s1706_s1, %s1249_s10  ;;  %v296_v47 = vand.u32 4294901760, %v295_v39  ;;  %v308_v48 = vand.u32 4294901760, %v307_v40  ;;  %v779_v49 = vand.u32 4294901760, %v778_v43  ;;  %v1330_v59 = vpack.c.bf16 %v300_v27, %v288_v24 }
  0x19   : > { %v183_v35 = vld [vmem:[%s182_s25] sm:$0xff]  ;;  %v1318_v41 = vpack.c.bf16 %v302_v37, %v290_v34  ;;  %v786_v50 = vand.u32 4294901760, %v785_v44  ;;  %v1332_v60 = vpack.c.bf16 %v306_v30, %v294_v29  ;;  %v1351_v61 = vpack.c.bf16 %v784_v33, %v777_v32  ;;  %p1422_p12 = pnand %p1421_p11, %p1546_p5  ;;  %s1424_s9 = sshll.u32 %s1487_s8, 4  ;;  %s1425_s9 = int_to_ptr.vmem [resolvable:$false] %s1424_s9 }
  0x1a   : > { %v184_v36 = vld [vmem:[%s178_s19] sm:$0xff]  ;;  %v1320_v53 = vpack.c.bf16 %v308_v48, %v296_v47  ;;  %s1426_s10 = scalar_lea.vmem %s1425_s9, 768  ;;  %p1427_p0 = scmp.lt.s32.totalorder %s1665_s30, %s1425_s9 }
  0x1b   : > { %v185_v38 = vsub.f32 %v183_v35, %v184_v36  ;;  %1319 = vmatprep.subr.bf16.mxu0 %v1318_v41  ;;  %v1342_v54 = vpack.c.bf16 %v786_v50, %v779_v49  ;;  %p1423_p13 = pneg %p1422_p12  ;;  %p1428_p1 = scmp.lt.s32.totalorder %s1426_s10, %s1420_s7 }
  0x1d   : > { %v194_v42 = vsel %vm192_vm2, %v185_v38, 0  ;;  %p1429_p2 = por %p1428_p1, %p1427_p0 }
  0x1e   : > { %v275_v45 = vand.u32 4294901760, %v194_v42 }
  0x1f   : > { %p1430_p3 = pnand %p1429_p2, %p1423_p13 }
  0x20   : > { %v276_v46 = vsub.f32 %v194_v42, %v275_v45 }
  0x22   : > { %v277_v51 = vand.u32 4294901760, %v276_v46 }
  0x24   : > { %v278_v52 = vsub.f32 %v276_v46, %v277_v51 }
  0x26   : > { %v279_v55 = vand.u32 4294901760, %v278_v52 }
  0x28   : > { %280 = vmatmul.mubr.f32.vlgmr.msra.gmra.mrb[0].mxu0 %v279_v55  ;;  %1277 = vmatmul.mubr.f32.vlgmr.msra.gmra.mrb[0].mxu1 %v279_v55 }
  0x29   : > { %1321 = vmatpush1.bf16.msra.mxu0 %v1320_v53  ;;  %1343 = vmatpush3.bf16.msra.mxu1 %v1342_v54 }
  0x2a   : > { %370 = vmatprep.mubr.f32.mxu0 %v1485_v17  ;;  %1323 = vmatprep.subr.bf16.mxu0 %v1322_v56 }
  0x2b   : > { %1283 = vmatprep.mubr.msk.f32.mxu1 %vm1486_vm1, %v1485_v17  ;;  %1344 = vmatprep.subr.bf16.mxu1 %v1484_v7 }
  0x30   : > { %372 = vmatmul.mubr.f32.vlgmr.msra.gmra.mrb[0].mxu0 %v275_v45  ;;  %1284 = vmatmul.mubr.f32.vlgmr.msra.gmra.mrb[0].mxu1 %v275_v45 }
  0x31   : > { %1325 = vmatpush1.bf16.msra.mxu0 %v1324_v57  ;;  %1346 = vmatpush3.bf16.msra.mxu1 %v1345_v58 }
  0x32   : > { %450 = vmatprep.mubr.f32.mxu0 %v1485_v17  ;;  %1327 = vmatprep.subr.bf16.mxu0 %v1584_v18 }
  0x33   : > { %1290 = vmatprep.mubr.msk.f32.mxu1 %vm1486_vm1, %v1485_v17  ;;  %1347 = vmatprep.subr.bf16.mxu1 %v1484_v7 }
  0x38   : > { %453 = vmatmul.mubr.f32.vlgmr.msra.gmra.mrb[0].mxu0 %v276_v46  ;;  %1291 = vmatmul.mubr.f32.vlgmr.msra.gmra.mrb[0].mxu1 %v276_v46 }
  0x39   : > { %1329 = vmatpush1.bf16.msra.mxu0 %v1590_v22  ;;  %1349 = vmatpush3.bf16.msra.mxu1 %v1597_v25 }
  0x3a   : > { %527 = vmatprep.mubr.f32.mxu0 %v1485_v17  ;;  %1331 = vmatprep.subr.bf16.mxu0 %v1330_v59 }
  0x3b   : > { %1297 = vmatprep.mubr.msk.f32.mxu1 %vm1486_vm1, %v1485_v17  ;;  %1350 = vmatprep.subr.bf16.mxu1 %v1484_v7 }
  0x40   : > { %531 = vmatmul.mubr.f32.vlgmr.msra.gmra.mrb[0].mxu0 %v277_v51  ;;  %1298 = vmatmul.mubr.f32.vlgmr.msra.gmra.mrb[0].mxu1 %v277_v51 }
  0x41   : > { %1333 = vmatpush1.bf16.msra.mxu0 %v1332_v60  ;;  %1352 = vmatpush3.bf16.msra.mxu1 %v1351_v61 }
  0x42   : > { %613 = vmatprep.mubr.f32.mxu0 %v1485_v17  ;;  %1335 = vmatprep.subr.bf16.mxu0 %v1584_v18 }
  0x43   : > { %1304 = vmatprep.mubr.msk.f32.mxu1 %vm1486_vm1, %v1485_v17  ;;  %1353 = vmatprep.subr.bf16.mxu1 %v1484_v7 }
  0x48   : > { %615 = vmatmul.mubr.f32.vlgmr.msra.gmra.mrb[0].mxu0 %v275_v45  ;;  %1305 = vmatmul.mubr.f32.vlgmr.msra.gmra.mrb[0].mxu1 %v275_v45 }
  0x49   : > { %1337 = vmatpush1.bf16.msra.mxu0 %v1590_v22  ;;  %1355 = vmatpush3.bf16.msra.mxu1 %v1597_v25 }
  0x4a   : > { %689 = vmatprep.mubr.f32.mxu0 %v1485_v17  ;;  %1311 = vmatprep.mubr.msk.f32.mxu1 %vm1486_vm1, %v1485_v17 }
  0x50   : > { %691 = vmatmul.mubr.f32.vlgmr.msra.gmra.mrb[0].mxu0 %v275_v45  ;;  %1312 = vmatmul.mubr.f32.vlgmr.msra.gmra.mrb[0].mxu1 %v275_v45 }
 0x123   : > { %v692_v62 = vpop.f32.mrb[0].mxu0  ;;  %v1152_v63 = vpop.f32.mrb[0].mxu1 }
 0x124   : > { %1156 = vst [vmem:[%s174_s29] sm:$0xff] %v692_v62  ;;  %1158 = vst [vmem:[%s174_s29 + $0x10] sm:$0xff] %v1152_v63  ;;  %v694_v0 = vpop.f32.mrb[1].mxu0  ;;  %v1313_v1 = vpop.f32.mrb[1].mxu1 }
 0x125   : > { %1157 = vst [vmem:[%s174_s29 + $0x8] sm:$0xff] %v694_v0 }
 0x126   : > { %1433 = shalt.err (!%p1430_p3)
}
 0x127   : > { %s1434_s11 = scalar_lea.hbm %s1663_s6, 384  ;;  %s1438_s20 = scalar_lea.hbm %s1708_s3, 1536 }
 0x128   : > { %p1435_p4 = scmp.ne.s32.totalorder %s1663_s6, %s1434_s11  ;;  %p1439_p9 = scmp.lt.u32.totalorder %s1663_s6, %s1708_s3 }
 0x129   : > { %p1440_p10 = scmp.lt.u32.totalorder %s1438_s20, %s1434_s11  ;;  %p1442_p12 = scmp.lt.u32.totalorder %s1434_s11, %s1663_s6 }
 0x12a   : > { %p1436_p7 = pnand %p1435_p4, %p1546_p5 }
 0x12b   : > { %p1441_p11 = por %p1440_p10, %p1439_p9 }
 0x12c   : > { %p1437_p8 = pneg %p1436_p7 }
 0x12d   : > { %p1443_p13 = por %p1442_p12, %p1441_p11 }
 0x12f   : > { %p1444_p0 = pnand %p1443_p13, %p1437_p8 }
 0x131   : > { %1447 = shalt.err (!%p1444_p0)
}
 0x132   : > { %1378 = dma.vmem_to_hbm [thread:$0]  (%p1546_p5), %s1665_s30, 384, %s1663_s6, %s1160_s16  }
 0x133 PF: > { %p1384_p1 = scmp.ge.s32.totalorder %s1482_s15, 2  ;;  %s1186_s26 = sand.u32 1, %s1470_s12  }
 0x134   : > { %s1187_s27 = scalar_lea.sflag [#allocation3], %s1186_s26 }
 0x135   : > { %p1381_p2 = pnand %p1384_p1, %p1550_p6 }
 0x137   : > { %1465 = dma.done.wait (!%p1381_p2), %s1187_s27, 384  }
 0x138   : > { %1467 = vsyncadd (!%p1381_p2), %s1187_s27, 4294966912  ;;  %p13_p3 = scmp.ge.s32.totalorder %s1533_s18, 6   ;;  %s1711_s12 = smov %s1474_s13 }
 0x139   : > { %s1712_s13 = smov %s1478_s14  ;;  %s1713_s14 = smov %s1544_s21 }
 0x13a   : > { %s1714_s15 = smov %s1533_s18  ;;  %15 = sbr.rel (!%p13_p3) target bundleno = 3 (0x3), region = 70 }
 0x141   :  { %1192 = vsyncpa [#allocation3], 1 }
 0x142   :  { %1194 = vsyncpa [#allocation3 + $0x1], 1 }

</bundles_post_ra>
